<compile_context>
chip_gen: v7x
topology: tpu7x:2x2x1
jax: 0.10.0
libtpu: 0.0.40
codegen_flags: <defaults>
</compile_context>

<pallas_src>
import jax
import jax.numpy as jnp
from jax import lax
from jax.experimental import pallas as pl
from jax.experimental.pallas import tpu as pltpu


# ---------------------------------------------------------------------------
# Kernels
# ---------------------------------------------------------------------------

def policy_batched_kernel(x_ref, w1_ref, w2_ref, b2_ref, o_ref):
    """Batched, lane-dense, MXU path.

    x_ref : (8, bt)   rows 0..3 = x^T (features), row 4 = ones, rows 5..7 = 0
    w1_ref: (128, 8)  cols 0..3 = fc1.weight (out, in), col 4 = fc1.bias
    w2_ref: (2, 128)  fc2.weight (out, in)
    b2_ref: (2, 1)    fc2.bias
    o_ref : (2, bt)   row 0 = P(action 0), row 1 = P(action 1)
    """
    # fc1 (+ bias via the ones-row of x_aug) on the MXU.
    h = jnp.dot(w1_ref[...], x_ref[...],
                preferred_element_type=jnp.float32)          # (128, bt)
    h = jnp.maximum(h, 0.0)                                  # ReLU

    # fc2 on the MXU; logits already lane-dense (actions along sublanes).
    logits = jnp.dot(w2_ref[...], h,
                     preferred_element_type=jnp.float32) + b2_ref[...]  # (2, bt)

    # softmax over the 2 actions == sigmoid of the logit difference.
    p0 = 1.0 / (1.0 + jnp.exp(logits[1:2, :] - logits[0:1, :]))          # (1, bt)

    # Single full-lane-width store of the (2, bt) probability block.
    o_ref[...] = jnp.concatenate([p0, 1.0 - p0], axis=0)


def policy_single_kernel(x_ref, w1t_ref, w2_ref, b2_ref, o_ref):
    """Grid-free single-state path (dispatch-bound; pure VPU/XLU, no MXU).

    x_ref  : SMEM (4,)   state
    w1t_ref: VMEM (8,128) rows 0..3 = fc1.weight^T, row 4 = fc1.bias, rest 0
    w2_ref : VMEM (2,128) fc2.weight
    b2_ref : SMEM (2,)    fc2.bias
    o_ref  : VMEM (1, 2)  action probabilities
    """
    w = w1t_ref[...]                                   # one f32 vreg
    # fc1 + bias: 4 scalar-broadcast FMAs on the VPU (K=4 is degenerate for MXU).
    h = (w[4:5, :]
         + x_ref[0] * w[0:1, :]
         + x_ref[1] * w[1:2, :]
         + x_ref[2] * w[2:3, :]
         + x_ref[3] * w[3:4, :])
    h = jnp.maximum(h, 0.0)                            # (1, 128)

    # Only the logit difference matters for the 2-way softmax.
    wd = w2_ref[0:1, :] - w2_ref[1:2, :]               # (1, 128)
    d = jnp.sum(h * wd, axis=-1, keepdims=True) + (b2_ref[0] - b2_ref[1])  # (1,1)

    # Build [p0, p1] = [sigmoid(d), sigmoid(-d)] and store once.
    idx = lax.broadcasted_iota(jnp.int32, (1, 2), 1)
    signed = jnp.where(idx == 0, d, -d)                # (1, 2)
    o_ref[...] = 1.0 / (1.0 + jnp.exp(-signed))


# ---------------------------------------------------------------------------
# Parameter packing (done once per parameter update)
# ---------------------------------------------------------------------------

def pack_params(w1, b1, w2, b2):
    """w1: (4,128) in->out, b1: (128,), w2: (128,2) in->out, b2: (2,)."""
    w1_aug = jnp.zeros((128, 8), jnp.float32)
    w1_aug = w1_aug.at[:, 0:4].set(w1.T.astype(jnp.float32))   # (out, in)
    w1_aug = w1_aug.at[:, 4].set(b1.astype(jnp.float32))       # bias column
    w2m = w2.T.astype(jnp.float32)                             # (2, 128)
    return {
        "w1_aug": w1_aug,            # batched path, (128, 8)
        "w1t_aug": w1_aug.T,         # single-state path, (8, 128)
        "w2": w2m,                   # (2, 128)
        "b2_col": b2.reshape(2, 1).astype(jnp.float32),
        "b2_vec": b2.astype(jnp.float32),
    }


# ---------------------------------------------------------------------------
# Wrappers
# ---------------------------------------------------------------------------

def policy_forward(x, params):
    """Single state x: (4,) -> probs over 2 actions, shape (2,). Grid-free."""
    x1 = x.reshape(4).astype(jnp.float32)
    out = pl.pallas_call(
        policy_single_kernel,
        out_shape=jax.ShapeDtypeStruct((1, 2), jnp.float32),
        in_specs=[
            pl.BlockSpec(memory_space=pltpu.MemorySpace.SMEM),   # x (scalars)
            pl.BlockSpec(memory_space=pltpu.MemorySpace.VMEM),   # w1t_aug
            pl.BlockSpec(memory_space=pltpu.MemorySpace.VMEM),   # w2
            pl.BlockSpec(memory_space=pltpu.MemorySpace.SMEM),   # b2
        ],
        out_specs=pl.BlockSpec(memory_space=pltpu.MemorySpace.VMEM),
    )(x1, params["w1t_aug"], params["w2"], params["b2_vec"])
    return out.reshape(2)


def policy_forward_batched(xb, params, *, block_b=512):
    """Batched rollout: xb (B, 4) -> probs (B, 2), per-state softmax.

    block_b must be a multiple of 128; the batch is zero-padded up to a
    multiple of block_b.  Weights stay VMEM-resident (constant index_maps).
    On v7x, pick block_b so the grid length stays >= 2 and both TensorCores
    get work (the batch axis is marked "parallel").
    """
    B = xb.shape[0]
    bb = int(block_b)
    assert bb % 128 == 0, "block_b must be a multiple of 128"
    Bp = ((B + bb - 1) // bb) * bb

    # Augmented, transposed input: rows 0..3 = x^T, row 4 = ones (bias lane),
    # padded batch columns stay all-zero (harmless, sliced away below).
    x_aug = jnp.zeros((8, Bp), jnp.float32)
    x_aug = x_aug.at[0:4, :B].set(xb.T.astype(jnp.float32))
    x_aug = x_aug.at[4, :B].set(1.0)

    out = pl.pallas_call(
        policy_batched_kernel,
        out_shape=jax.ShapeDtypeStruct((2, Bp), jnp.float32),
        grid=(Bp // bb,),
        in_specs=[
            pl.BlockSpec((8, bb), lambda i: (0, i)),      # x_aug blocks
            pl.BlockSpec((128, 8), lambda i: (0, 0)),     # w1_aug (resident)
            pl.BlockSpec((2, 128), lambda i: (0, 0)),     # w2     (resident)
            pl.BlockSpec((2, 1), lambda i: (0, 0)),       # b2     (resident)
        ],
        out_specs=pl.BlockSpec((2, bb), lambda i: (0, i)),
        compiler_params=pltpu.CompilerParams(
            dimension_semantics=("parallel",)),
    )(x_aug, params["w1_aug"], params["w2"], params["b2_col"])
    return out[:, :B].T                                   # (B, 2)


# ---------------------------------------------------------------------------
# Reference + init
# ---------------------------------------------------------------------------

def init_params(key):
    """torch.nn.Linear default init: U(-k, k), k = 1/sqrt(fan_in)."""
    k1, k2, k3, k4 = jax.random.split(key, 4)
    bound1 = 1.0 / jnp.sqrt(4.0)
    bound2 = 1.0 / jnp.sqrt(128.0)
    w1 = jax.random.uniform(k1, (4, 128), jnp.float32, -bound1, bound1)
    b1 = jax.random.uniform(k2, (128,), jnp.float32, -bound1, bound1)
    w2 = jax.random.uniform(k3, (128, 2), jnp.float32, -bound2, bound2)
    b2 = jax.random.uniform(k4, (2,), jnp.float32, -bound2, bound2)
    return w1, b1, w2, b2


def policy_reference(x, w1, b1, w2, b2):
    hp = lax.Precision.HIGHEST
    h = jnp.maximum(jnp.dot(x, w1, precision=hp) + b1, 0.0)
    return jax.nn.softmax(jnp.dot(h, w2, precision=hp) + b2, axis=-1)


# TODO(synk): put_data/train_net (return accumulation + Adam step) are host-side
# training logic with no kernel equivalent; only the forward pass is implemented.

if __name__ == "__main__":
    key = jax.random.PRNGKey(0)
    kx, kb, kp = jax.random.split(key, 3)

    w1, b1, w2, b2 = init_params(kp)
    params = pack_params(w1, b1, w2, b2)

    # --- single CartPole-like state: what the torch module's forward sees ---
    x = jax.random.normal(kx, (4,), jnp.float32)
    probs = jax.block_until_ready(policy_forward(x, params))
    ref = policy_reference(x, w1, b1, w2, b2)
    assert probs.shape == (2,)
    assert jnp.allclose(jnp.sum(probs), 1.0, atol=1e-5)
    assert jnp.allclose(probs, ref, atol=1e-5, rtol=1e-5)

    # --- batched rollout path: small batch (single grid step after padding) ---
    xb = jax.random.normal(kb, (16, 4), jnp.float32)
    probs_b = jax.block_until_ready(policy_forward_batched(xb, params))
    ref_b = policy_reference(xb, w1, b1, w2, b2)
    assert probs_b.shape == (16, 2)
    assert jnp.allclose(jnp.sum(probs_b, axis=-1), 1.0, atol=1e-5)
    assert jnp.allclose(probs_b, ref_b, atol=1e-4, rtol=1e-4)

    # --- larger batch: multiple grid steps, resident weights exercised ---
    xc = jax.random.normal(jax.random.fold_in(kb, 1), (1024, 4), jnp.float32)
    probs_c = jax.block_until_ready(
        policy_forward_batched(xc, params, block_b=512))
    ref_c = policy_reference(xc, w1, b1, w2, b2)
    assert probs_c.shape == (1024, 2)
    assert jnp.allclose(probs_c, ref_c, atol=1e-4, rtol=1e-4)

    print("KERNEL_OK")
</pallas_src>

<mosaic_0001>
module attributes {stable_mosaic.version = 11 : i64} {
  func.func @policy_single_kernel(%arg0: memref<4xf32, #tpu.memory_space<smem>>, %arg1: memref<8x128xf32, #tpu.memory_space<vmem>>, %arg2: memref<2x128xf32, #tpu.memory_space<vmem>>, %arg3: memref<2xf32, #tpu.memory_space<smem>>, %arg4: memref<1x2xf32, #tpu.memory_space<vmem>>) attributes {dimension_semantics = [], scalar_prefetch = 0 : i64, scratch_operands = 0 : i64, tpu.core_type = #tpu.core_type<tc>} {
    %c0 = arith.constant 0 : index
    %c0_0 = arith.constant 0 : index
    %0 = vector.load %arg1[%c0, %c0_0] : memref<8x128xf32, #tpu.memory_space<vmem>>, vector<8x128xf32>
    %1 = vector.extract_strided_slice %0 {offsets = [4, 0], sizes = [1, 128], strides = [1, 1]} : vector<8x128xf32> to vector<1x128xf32>
    %c0_1 = arith.constant 0 : index
    %2 = memref.load %arg0[%c0_1] : memref<4xf32, #tpu.memory_space<smem>>
    %3 = vector.extract_strided_slice %0 {offsets = [0, 0], sizes = [1, 128], strides = [1, 1]} : vector<8x128xf32> to vector<1x128xf32>
    %4 = vector.broadcast %2 : f32 to vector<1x128xf32>
    %5 = arith.mulf %4, %3 : vector<1x128xf32>
    %6 = arith.addf %1, %5 : vector<1x128xf32>
    %c1 = arith.constant 1 : index
    %7 = memref.load %arg0[%c1] : memref<4xf32, #tpu.memory_space<smem>>
    %8 = vector.extract_strided_slice %0 {offsets = [1, 0], sizes = [1, 128], strides = [1, 1]} : vector<8x128xf32> to vector<1x128xf32>
    %9 = vector.broadcast %7 : f32 to vector<1x128xf32>
    %10 = arith.mulf %9, %8 : vector<1x128xf32>
    %11 = arith.addf %6, %10 : vector<1x128xf32>
    %c2 = arith.constant 2 : index
    %12 = memref.load %arg0[%c2] : memref<4xf32, #tpu.memory_space<smem>>
    %13 = vector.extract_strided_slice %0 {offsets = [2, 0], sizes = [1, 128], strides = [1, 1]} : vector<8x128xf32> to vector<1x128xf32>
    %14 = vector.broadcast %12 : f32 to vector<1x128xf32>
    %15 = arith.mulf %14, %13 : vector<1x128xf32>
    %16 = arith.addf %11, %15 : vector<1x128xf32>
    %c3 = arith.constant 3 : index
    %17 = memref.load %arg0[%c3] : memref<4xf32, #tpu.memory_space<smem>>
    %18 = vector.extract_strided_slice %0 {offsets = [3, 0], sizes = [1, 128], strides = [1, 1]} : vector<8x128xf32> to vector<1x128xf32>
    %19 = vector.broadcast %17 : f32 to vector<1x128xf32>
    %20 = arith.mulf %19, %18 : vector<1x128xf32>
    %21 = arith.addf %16, %20 : vector<1x128xf32>
    %cst = arith.constant 0.000000e+00 : f32
    %22 = vector.broadcast %cst : f32 to vector<1x128xf32>
    %23 = arith.maximumf %21, %22 : vector<1x128xf32>
    %c0_2 = arith.constant 0 : index
    %c0_3 = arith.constant 0 : index
    %24 = vector.load %arg2[%c0_2, %c0_3] : memref<2x128xf32, #tpu.memory_space<vmem>>, vector<1x128xf32>
    %c1_4 = arith.constant 1 : index
    %c0_5 = arith.constant 0 : index
    %25 = vector.load %arg2[%c1_4, %c0_5] : memref<2x128xf32, #tpu.memory_space<vmem>>, vector<1x128xf32>
    %26 = arith.subf %24, %25 : vector<1x128xf32>
    %27 = arith.mulf %23, %26 : vector<1x128xf32>
    %cst_6 = arith.constant dense<0.000000e+00> : vector<1xf32>
    %28 = vector.multi_reduction <add>, %27, %cst_6 [1] : vector<1x128xf32> to vector<1xf32>
    %29 = vector.shape_cast %28 : vector<1xf32> to vector<1x1xf32>
    %c0_7 = arith.constant 0 : index
    %30 = memref.load %arg3[%c0_7] : memref<2xf32, #tpu.memory_space<smem>>
    %c1_8 = arith.constant 1 : index
    %31 = memref.load %arg3[%c1_8] : memref<2xf32, #tpu.memory_space<smem>>
    %32 = arith.subf %30, %31 : f32
    %33 = vector.broadcast %32 : f32 to vector<1x1xf32>
    %34 = arith.addf %29, %33 : vector<1x1xf32>
    %35 = tpu.iota {dimensions = array<i32: 1>} : vector<1x2xi32>
    %c0_i32 = arith.constant 0 : i32
    %36 = vector.broadcast %c0_i32 : i32 to vector<1x2xi32>
    %37 = arith.cmpi eq, %35, %36 : vector<1x2xi32>
    %cst_9 = arith.constant 0.000000e+00 : f32
    %38 = vector.broadcast %cst_9 : f32 to vector<1x1xf32>
    %39 = arith.subf %38, %34 : vector<1x1xf32>
    %40 = vector.shape_cast %34 : vector<1x1xf32> to vector<1x1xf32>
    %41 = vector.broadcast %40 : vector<1x1xf32> to vector<1x2xf32>
    %42 = vector.shape_cast %39 : vector<1x1xf32> to vector<1x1xf32>
    %43 = vector.broadcast %42 : vector<1x1xf32> to vector<1x2xf32>
    %44 = arith.select %37, %41, %43 : vector<1x2xi1>, vector<1x2xf32>
    %cst_10 = arith.constant 0.000000e+00 : f32
    %45 = vector.broadcast %cst_10 : f32 to vector<1x2xf32>
    %46 = arith.subf %45, %44 : vector<1x2xf32>
    %47 = math.exp %46 : vector<1x2xf32>
    %cst_11 = arith.constant 1.000000e+00 : f32
    %48 = vector.broadcast %cst_11 : f32 to vector<1x2xf32>
    %49 = arith.addf %48, %47 : vector<1x2xf32>
    %cst_12 = arith.constant 1.000000e+00 : f32
    %50 = vector.broadcast %cst_12 : f32 to vector<1x2xf32>
    %51 = arith.divf %50, %49 : vector<1x2xf32>
    %c0_13 = arith.constant 0 : index
    %c0_14 = arith.constant 0 : index
    %52 = vector.load %arg4[%c0_13, %c0_14] : memref<1x2xf32, #tpu.memory_space<vmem>>, vector<1x2xf32>
    tpu.vector_store %arg4[%c0_13, %c0_14], %51 {strides = array<i32>} : memref<1x2xf32, #tpu.memory_space<vmem>>, vector<1x2xf32>,
    return
  }
}

</mosaic_0001>

<bundles_post_ra>
// kernel: tpu_custom_call.1
= control target key start
LH: loop header
LB: loop body
LE: loop exit
PB: predicated region body
PF: predicated region fallthrough
CT: control target
= control target key end

     0   :  { %9 = vsyncpa [#allocation5], 0  ;;  %s289_s0 = inlined_call_operand.hbm [shape: f32[4], index: 0, kind: input, shape index: {}]   ;;  %s290_s1 = inlined_call_operand.hbm [shape: f32[8,128], index: 1, kind: input, shape index: {}]   ;;  %s291_s2 = inlined_call_operand.vmem [shape: f32[2,128], index: 2, kind: input, shape index: {}]   ;;  %s292_s3 = inlined_call_operand.vmem [shape: f32[2], index: 3, kind: input, shape index: {}]   ;;  %s293_s4 = inlined_call_operand.hbm [shape: f32[1,2], index: 4, kind: output, shape index: {}]  }
   0x1   :  { %10 = vsyncpa [#allocation3], 0 }
   0x2   :  { %11 = vsyncpa [#allocation6], 0 }
   0x3   :  { %12 = vsyncpa [#allocation4], 0  ;;  %s141_s17 = scalar_lea.hbm %s289_s0, 16 }
   0x4   :  { %p142_p0 = scmp.ne.s32.totalorder %s289_s0, %s141_s17  ;;  %p145_p1 = scmp.lt.u32.totalorder %s141_s17, %s289_s0 }
   0x6   :  { %p147_p2 = pnand %p145_p1, %p142_p0 }
   0x8   :  { %150 = shalt.err (!%p147_p2)
}
   0x9   :  { %s215_s22 = smov [#allocation2]   ;;  %s216_s25 = smov [#allocation7]  }
   0xa   :  { %20 = dma.hbm_to_smem %s289_s0, 16, %s215_s22, [#allocation5]  }
   0xb   :  { %s27_s26 = sshll.u32 %s216_s25, 4  ;;  %s39_s29 = sshll.u32 %s292_s3, 4  ;;  %s28_s26 = int_to_ptr.vmem [resolvable:$true] %s27_s26  ;;  %s40_s29 = int_to_ptr.vmem [resolvable:$true] %s39_s29 }
   0xc   :  { %s151_s6 = scalar_lea.hbm %s290_s1, 128 }
   0xd   :  { %p152_p3 = scmp.ne.s32.totalorder %s290_s1, %s151_s6  ;;  %p155_p4 = scmp.lt.u32.totalorder %s151_s6, %s290_s1 }
   0xf   :  { %p157_p5 = pnand %p155_p4, %p152_p3 }
  0x11   :  { %160 = shalt.err (!%p157_p5)
}
  0x12   :  { %s161_s0 = scalar_lea.vmem %s28_s26, 128  ;;  %p166_p7 = scmp.lt.s32.totalorder %s28_s26, %s28_s26 }
  0x13   :  { %p162_p6 = scmp.ne.s32.totalorder %s28_s26, %s161_s0  ;;  %p167_p8 = scmp.lt.s32.totalorder %s161_s0, %s161_s0 }
  0x15   :  { %p168_p9 = por %p167_p8, %p166_p7 }
  0x17   :  { %p169_p10 = pnand %p168_p9, %p162_p6 }
  0x19   :  { %172 = shalt.err (!%p169_p10)
}
  0x1a   :  { %30 = dma.hbm_to_vmem [thread:$0]  %s290_s1, 128, %s28_s26, [#allocation3]  }
  0x1b   :  { %s173_s12 = scalar_lea.vmem %s40_s29, 16  ;;  %p178_p12 = scmp.lt.s32.totalorder %s40_s29, %s40_s29 }
  0x1c   :  { %p174_p11 = scmp.ne.s32.totalorder %s40_s29, %s173_s12  ;;  %p179_p13 = scmp.lt.s32.totalorder %s173_s12, %s173_s12 }
  0x1e   :  { %p180_p0 = por %p179_p13, %p178_p12 }
  0x20   :  { %p181_p1 = pnand %p180_p0, %p174_p11 }
  0x22   :  { %184 = shalt.err (!%p181_p1)
}
  0x23   :  { %s217_s13 = smov [#allocation8]  }
  0x24   :  { %42 = dma.vmem_to_smem %s40_s29, 16, %s217_s13, [#allocation6]  }
  0x25   :  { %207 = dma.done.wait [#allocation5], 16  }
  0x26   :  { %208 = vsyncadd [#allocation5], 4294967280 }
  0x27   :  { %209 = dma.done.wait [#allocation3], 128  }
  0x28   :  { %210 = vsyncadd [#allocation3], 4294967168 }
  0x29   :  { %211 = dma.done.wait [#allocation6], 16  }
  0x2a   :  { %212 = vsyncadd [#allocation6], 4294967280 }
  0x2b   :  { %52 = sfence }
  0x2c   :  { %s54_s14 = sld [smem:[#allocation2]]  ;;  %s129_s15 = sld [smem:[#allocation2 + $0x1]]  ;;  %v53_v0 = vld [vmem:[#allocation7] sm:$0xff]  ;;  %v83_v11 = vld [vmem:[%s291_s2] sm:$0x1]  ;;  %vm90_vm0 = vcmask 1044484   ;;  %v99_v24 = vlaneseq }
  0x2d   :  { %s130_s16 = sld [smem:[#allocation2 + $0x2]]  ;;  %s131_s1 = sld [smem:[#allocation2 + $0x3]]  ;;  %v84_v12 = vld [vmem:[%s291_s2 + $0x1] sm:$0x1]  ;;  %vm110_vm2 = vcmask 12292  }
  0x2e   :  { %v85_v17 = vsub.f32 %v83_v11, %v84_v12  ;;  %s94_s21 = sld [smem:[#allocation8]]  ;;  %s132_s22 = sld [smem:[#allocation8 + $0x1]]  ;;  %v100_v26 = vand.u32 127, %v99_v24 }
  0x2f   :  { %s218_s2 = smov [#allocation9]  }
  0x30   :  { %v87_v20 = vrot.slane %v85_v17, 4  ;;  %vm101_vm1 = vcmp.eq.s32.totalorder %v100_v26, 0  ;;  %s118_s24 = sshll.u32 %s218_s2, 4  ;;  %s119_s24 = int_to_ptr.vmem [resolvable:$true] %s118_s24 }
  0x31   :  { %s185_s25 = scalar_lea.vmem %s119_s24, 16  ;;  %s189_s26 = scalar_lea.vmem %s119_s24, 32 }
  0x32   :  { %v55_v1 = vstv %s54_s14  ;;  %v62_v2 = vstv %s129_s15  ;;  %p186_p2 = scmp.ne.s32.totalorder %s119_s24, %s185_s25  ;;  %p190_p3 = scmp.lt.s32.totalorder %s119_s24, %s119_s24 }
  0x33   :  { %v56_v3 = vmul.f32 %v55_v1, %v53_v0  ;;  %v63_v4 = vmul.f32 %v62_v2, %v53_v0  ;;  %v69_v5 = vstv %s130_s16  ;;  %v76_v6 = vstv %s131_s1  ;;  %p191_p4 = scmp.lt.s32.totalorder %s189_s26, %s185_s25 }
  0x34   :  { %v70_v7 = vmul.f32 %v69_v5, %v53_v0  ;;  %v77_v10 = vmul.f32 %v76_v6, %v53_v0  ;;  %s96_s23 = ssub.f32 %s94_s21, %s132_s22 }
  0x35   :  { %v58_v8 = vrot.slane %v56_v3, 4  ;;  %v65_v9 = vrot.slane %v63_v4, 5  ;;  %p192_p5 = por %p191_p4, %p190_p3 }
  0x36   :  { %v72_v14 = vrot.slane %v70_v7, 6  ;;  %v79_v16 = vrot.slane %v77_v10, 7  ;;  %v97_v25 = vstv %s96_s23 }
  0x37   :  { %v60_v13 = vadd.f32 %v58_v8, %v53_v0  ;;  %p193_p6 = pnand %p192_p5, %p186_p2 }
  0x39   :  { %v67_v15 = vadd.f32 %v65_v9, %v60_v13 }
  0x3b   :  { %v74_v18 = vadd.f32 %v72_v14, %v67_v15 }
  0x3d   :  { %v81_v19 = vadd.f32 %v79_v16, %v74_v18 }
  0x3f   :  { %v82_v21 = vmax.f32 %v81_v19, 0.0 }
  0x41   :  { %v89_v22 = vmul.f32 %v87_v20, %v82_v21 }
  0x43   :  { %v91_v23 = vsel %vm90_vm0, %v89_v22, 0.0 }
  0x44   :  { %92 = vadd.xlane.f32.xlu0 %v91_v23 }
  0xd1   :  { %v93_v27 = vpop.xlane.xlu0 %92 }
  0xd2   :  { %v98_v28 = vadd.f32 %v97_v25, %v93_v27 }
  0xd4   :  { %v102_v29 = vsub.f32 0.0, %v98_v28 }
  0xd6   :  { %v103_v30 = vsel %vm101_vm1, %v98_v28, %v102_v29 }
  0xd7   :  { %v104_v31 = vsub.f32 0.0, %v103_v30 }
  0xd9   :  { %v105_v32 = vmul.f32 1.442695, %v104_v31 }
  0xdb   :  { %137 = vpow2.f32 %v105_v32 }
  0xe5   :  { %v138_v33 = vpop.eup %137 }
  0xe6   :  { %v107_v34 = vadd.f32 1.0, %v138_v33 }
  0xe8   :  { %139 = vrcp.f32 %v107_v34 }
  0xf2   :  { %v140_v35 = vpop.eup %139 }
  0xf3   :  { %111 = vst.msk [vmem:[#allocation9 - $0x4] sm:$0x10] %vm110_vm2, %v140_v35 }
  0xf4   :  { %196 = shalt.err (!%p193_p6)
}
  0xf5   :  { %s197_s29 = scalar_lea.hbm %s293_s4, 16 }
  0xf6   :  { %p198_p7 = scmp.ne.s32.totalorder %s293_s4, %s197_s29  ;;  %p201_p8 = scmp.lt.u32.totalorder %s197_s29, %s293_s4 }
  0xf8   :  { %p203_p9 = pnand %p201_p8, %p198_p7 }
  0xfa   :  { %206 = shalt.err (!%p203_p9)
}
  0xfb   :  { %121 = dma.vmem_to_hbm [thread:$0]  %s119_s24, 16, %s293_s4, [#allocation4]  }
  0xfc   :  { %213 = dma.done.wait [#allocation4], 16  }
  0xfd   :  { %214 = vsyncadd [#allocation4], 4294967280 }
  0xfe   :  { %125 = vsyncpa [#allocation3], 1 }
  0xff   :  { %126 = vsyncpa [#allocation4], 1 }
 0x100   :  { %127 = vsyncpa [#allocation5], 1 }
 0x101   :  { %128 = vsyncpa [#allocation6], 1 }

</bundles_post_ra>
